<compile_context>
chip_gen: v6e
topology: v6e:2x2x1
jax: 0.10.0
libtpu: 0.0.40
codegen_flags: <defaults>
</compile_context>

<pallas_src>
import jax
import jax.numpy as jnp
from jax.experimental import pallas as pl
from jax.experimental.pallas import tpu as pltpu

# Unpadded / padded hidden widths (per critic).
H1, H1P = 400, 512
H2, H2P = 300, 384

TB = 256  # batch tile for the gridded (training-sized-batch) path


# ---------------------------------------------------------------------------
# Fused kernel: both DroQ critics, full 3-layer MLP, one tile per invocation.
# ---------------------------------------------------------------------------
def twin_droq_kernel(sa_ref, w1_ref, b1_ref,
                     w2a_ref, b2a_ref, w2b_ref, b2b_ref,
                     w3a_ref, w3b_ref, b3_ref, q_ref):
    f32 = jnp.float32
    bf16 = jnp.bfloat16

    sa = sa_ref[...].astype(bf16)                          # (tb, d_in)

    # Layer 1: both critics fused into one (d_in, 1024)-wide matmul.
    h1 = jnp.dot(sa, w1_ref[...], preferred_element_type=f32) + b1_ref[...]
    h1 = jnp.maximum(h1, 0.0).astype(bf16)                 # (tb, 1024) = [net1 | net2]

    h1a = h1[:, :H1P]                                      # (tb, 512) critic 1 (tile-aligned)
    h1b = h1[:, H1P:]                                      # (tb, 512) critic 2

    # Layer 2 (per critic; zero-padded W2 rows/cols are inert).
    h2a = jnp.maximum(jnp.dot(h1a, w2a_ref[...], preferred_element_type=f32)
                      + b2a_ref[...], 0.0).astype(bf16)    # (tb, 384)
    h2b = jnp.maximum(jnp.dot(h1b, w2b_ref[...], preferred_element_type=f32)
                      + b2b_ref[...], 0.0).astype(bf16)    # (tb, 384)

    # Layer 3: split W3 -> no in-kernel concat, no dead K tiles.
    q_ref[...] = (jnp.dot(h2a, w3a_ref[...], preferred_element_type=f32)
                  + jnp.dot(h2b, w3b_ref[...], preferred_element_type=f32)
                  + b3_ref[...])                           # (tb, 2) f32  [q1 | q2]


def _vmem_spec():
    return pl.BlockSpec(memory_space=pltpu.MemorySpace.VMEM)


# ---------------------------------------------------------------------------
# Wrapper: one pallas_call for both critics, returns (q1, q2) like torch.
# ---------------------------------------------------------------------------
@jax.jit
def q_critic_forward(state, action, packed):
    B = state.shape[0]
    sa = jnp.concatenate([state, action], axis=-1)         # tiny (B, d_in) concat
    d_in = sa.shape[1]

    flops = 2 * B * (d_in * 2 * H1P + 2 * H1P * H2P + 2 * H2P * 2)
    bytes_accessed = (sum(int(x.size) * x.dtype.itemsize for x in (sa, *packed))
                      + B * 2 * 4)
    cost = pl.CostEstimate(flops=flops, transcendentals=0,
                           bytes_accessed=bytes_accessed)

    (w1, b1, w2a, b2a, w2b, b2b, w3a, w3b, b3) = packed

    if B >= 2 * TB and B % TB == 0:
        # Training-sized batch: tile the batch, keep weights VMEM-resident
        # (constant index_map), shard tiles across TCs on v7x ("parallel").
        def const(shape):
            return pl.BlockSpec(shape, lambda i: (0, 0))

        q_both = pl.pallas_call(
            twin_droq_kernel,
            out_shape=jax.ShapeDtypeStruct((B, 2), jnp.float32),
            grid=(B // TB,),
            in_specs=[pl.BlockSpec((TB, d_in), lambda i: (i, 0)),
                      const(w1.shape), const(b1.shape),
                      const(w2a.shape), const(b2a.shape),
                      const(w2b.shape), const(b2b.shape),
                      const(w3a.shape), const(w3b.shape), const(b3.shape)],
            out_specs=pl.BlockSpec((TB, 2), lambda i: (i, 0)),
            cost_estimate=cost,
            compiler_params=pltpu.CompilerParams(
                dimension_semantics=("parallel",)),
        )(sa, *packed)
    else:
        # Small eval batch: grid-less single invocation (one dispatch, one DMA
        # pipeline).  The call is weight-DMA bound at this size; the real
        # lever is batching more rows per call / cross-call weight residency.
        q_both = pl.pallas_call(
            twin_droq_kernel,
            out_shape=jax.ShapeDtypeStruct((B, 2), jnp.float32),
            in_specs=[_vmem_spec()] * 10,
            out_specs=_vmem_spec(),
            cost_estimate=cost,
            compiler_params=pltpu.CompilerParams(),
        )(sa, *packed)

    return q_both[:, 0:1], q_both[:, 1:2]


# ---------------------------------------------------------------------------
# Parameter init (torch.nn.Linear default: U(+-1/sqrt(fan_in))), stored (in, out)
# so the kernel computes x @ W directly.
# ---------------------------------------------------------------------------
def init_linear(key, fan_in, fan_out):
    kw, kb = jax.random.split(key)
    bound = 1.0 / (fan_in ** 0.5)
    w = jax.random.uniform(kw, (fan_in, fan_out), jnp.float32, -bound, bound)
    b = jax.random.uniform(kb, (fan_out,), jnp.float32, -bound, bound)
    return w, b


def init_droq(key, in_dim):
    k1, k2, k3 = jax.random.split(key, 3)
    w1, b1 = init_linear(k1, in_dim, H1)
    w2, b2 = init_linear(k2, H1, H2)
    w3, b3 = init_linear(k3, H2, 1)
    return (w1, b1, w2, b2, w3, b3)


def pack_twin_params(p1, p2, in_dim):
    """Pad + fuse both critics' params into the kernel's layout (bf16 weights)."""
    w1_1, b1_1, w2_1, b2_1, w3_1, b3_1 = p1
    w1_2, b1_2, w2_2, b2_2, w3_2, b3_2 = p2

    # Layer 1: both nets side by side, padded 400 -> 512 each.
    w1 = jnp.zeros((in_dim, 2 * H1P), jnp.float32)
    w1 = w1.at[:, :H1].set(w1_1).at[:, H1P:H1P + H1].set(w1_2)
    b1 = jnp.zeros((1, 2 * H1P), jnp.float32)
    b1 = b1.at[0, :H1].set(b1_1).at[0, H1P:H1P + H1].set(b1_2)

    # Layer 2: per-net, padded (400, 300) -> (512, 384).
    def pad_l2(w, b):
        wp = jnp.zeros((H1P, H2P), jnp.float32).at[:H1, :H2].set(w)
        bp = jnp.zeros((1, H2P), jnp.float32).at[0, :H2].set(b)
        return wp, bp

    w2a, b2a = pad_l2(w2_1, b2_1)
    w2b, b2b = pad_l2(w2_2, b2_2)

    # Layer 3: split per critic so the kernel needs no concat.
    w3a = jnp.zeros((H2P, 2), jnp.float32).at[:H2, 0].set(w3_1[:, 0])
    w3b = jnp.zeros((H2P, 2), jnp.float32).at[:H2, 1].set(w3_2[:, 0])
    b3 = jnp.stack([b3_1, b3_2], axis=-1).reshape(1, 2)

    bf = jnp.bfloat16
    # TODO(synk): optional fp8 (v7x) / int8+per-channel-scale (v5e/v6e) layer-2
    # weights would halve the dominant weight-DMA; needs accuracy validation.
    return (w1.astype(bf), b1,            # (d_in, 1024) bf16, (1, 1024) f32
            w2a.astype(bf), b2a,          # (512, 384) bf16,   (1, 384) f32
            w2b.astype(bf), b2b,
            w3a.astype(bf), w3b.astype(bf),  # (384, 2) bf16 each
            b3)                           # (1, 2) f32


if __name__ == "__main__":
    state_dim, action_dim = 12, 4

    root = jax.random.PRNGKey(0)
    _, _, k_net1, k_net2 = jax.random.split(root, 4)

    p1 = init_droq(k_net1, state_dim + action_dim)
    p2 = init_droq(k_net2, state_dim + action_dim)
    packed = pack_twin_params(p1, p2, state_dim + action_dim)

    # Reference 1: exact mirror of the kernel's bf16/f32 mixed-precision math.
    def mirror(state, action, packed):
        w1, b1, w2a, b2a, w2b, b2b, w3a, w3b, b3 = packed
        sa = jnp.concatenate([state, action], axis=-1).astype(jnp.bfloat16)
        h1 = jnp.maximum(
            jnp.dot(sa, w1, preferred_element_type=jnp.float32) + b1,
            0.0).astype(jnp.bfloat16)
        h2a = jnp.maximum(
            jnp.dot(h1[:, :H1P], w2a, preferred_element_type=jnp.float32) + b2a,
            0.0).astype(jnp.bfloat16)
        h2b = jnp.maximum(
            jnp.dot(h1[:, H1P:], w2b, preferred_element_type=jnp.float32) + b2b,
            0.0).astype(jnp.bfloat16)
        q = (jnp.dot(h2a, w3a, preferred_element_type=jnp.float32)
             + jnp.dot(h2b, w3b, preferred_element_type=jnp.float32) + b3)
        return q[:, 0:1], q[:, 1:2]

    # Reference 2: original f32 torch-style math (bf16 storage shifts results
    # at the ~1e-3 level -> loose tolerance).
    def torch_ref(sa, p):
        w1, b1, w2, b2, w3, b3 = p
        h1 = jnp.maximum(sa @ w1 + b1, 0.0)
        h2 = jnp.maximum(h1 @ w2 + b2, 0.0)
        return h2 @ w3 + b3

    # batch=8 exercises the grid-less eval path; batch=512 the gridded path.
    for batch in (8, 512):
        ks, ka = jax.random.split(jax.random.fold_in(root, batch))
        state = jax.random.normal(ks, (batch, state_dim), jnp.float32)
        action = jax.random.normal(ka, (batch, action_dim), jnp.float32)

        q1, q2 = q_critic_forward(state, action, packed)
        jax.block_until_ready((q1, q2))
        assert q1.shape == (batch, 1) and q2.shape == (batch, 1)

        r1, r2 = mirror(state, action, packed)
        assert jnp.allclose(q1, r1, atol=1e-3, rtol=1e-3), \
            float(jnp.max(jnp.abs(q1 - r1)))
        assert jnp.allclose(q2, r2, atol=1e-3, rtol=1e-3), \
            float(jnp.max(jnp.abs(q2 - r2)))

        sa = jnp.concatenate([state, action], axis=-1)
        t1, t2 = torch_ref(sa, p1), torch_ref(sa, p2)
        assert jnp.allclose(q1, t1, atol=5e-2, rtol=5e-2)
        assert jnp.allclose(q2, t2, atol=5e-2, rtol=5e-2)

    print("KERNEL_OK")
</pallas_src>

<mosaic_0001>
module attributes {stable_mosaic.version = 11 : i64} {
  func.func @twin_droq_kernel(%arg0: memref<8x16xf32, #tpu.memory_space<vmem>>, %arg1: memref<16x1024xbf16, #tpu.memory_space<vmem>>, %arg2: memref<1x1024xf32, #tpu.memory_space<vmem>>, %arg3: memref<512x384xbf16, #tpu.memory_space<vmem>>, %arg4: memref<1x384xf32, #tpu.memory_space<vmem>>, %arg5: memref<512x384xbf16, #tpu.memory_space<vmem>>, %arg6: memref<1x384xf32, #tpu.memory_space<vmem>>, %arg7: memref<384x2xbf16, #tpu.memory_space<vmem>>, %arg8: memref<384x2xbf16, #tpu.memory_space<vmem>>, %arg9: memref<1x2xf32, #tpu.memory_space<vmem>>, %arg10: memref<8x2xf32, #tpu.memory_space<vmem>>) attributes {dimension_semantics = [], scalar_prefetch = 0 : i64, scratch_operands = 0 : i64, tpu.core_type = #tpu.core_type<tc>} {
    %c0 = arith.constant 0 : index
    %c0_0 = arith.constant 0 : index
    %0 = vector.load %arg0[%c0, %c0_0] : memref<8x16xf32, #tpu.memory_space<vmem>>, vector<8x16xf32>
    %1 = arith.truncf %0 : vector<8x16xf32> to vector<8x16xbf16>
    %c0_1 = arith.constant 0 : index
    %c0_2 = arith.constant 0 : index
    %2 = vector.load %arg1[%c0_1, %c0_2] : memref<16x1024xbf16, #tpu.memory_space<vmem>>, vector<16x1024xbf16>
    %cst = arith.constant dense<0.000000e+00> : vector<8x1024xf32>
    %3 = tpu.matmul %1, %2, %cst {dimension_numbers = #tpu.dot_dimension_numbers<[1], [0], [0], [1], [0, 0, 1, 1], [], []>} : vector<8x16xbf16>, vector<16x1024xbf16>, vector<8x1024xf32> -> vector<8x1024xf32>
    %c0_3 = arith.constant 0 : index
    %c0_4 = arith.constant 0 : index
    %4 = vector.load %arg2[%c0_3, %c0_4] : memref<1x1024xf32, #tpu.memory_space<vmem>>, vector<1x1024xf32>
    %5 = vector.broadcast %4 : vector<1x1024xf32> to vector<8x1024xf32>
    %6 = arith.addf %3, %5 : vector<8x1024xf32>
    %cst_5 = arith.constant 0.000000e+00 : f32
    %7 = vector.broadcast %cst_5 : f32 to vector<8x1024xf32>
    %8 = arith.maximumf %6, %7 : vector<8x1024xf32>
    %9 = arith.truncf %8 : vector<8x1024xf32> to vector<8x1024xbf16>
    %10 = vector.extract_strided_slice %9 {offsets = [0, 0], sizes = [8, 512], strides = [1, 1]} : vector<8x1024xbf16> to vector<8x512xbf16>
    %11 = vector.extract_strided_slice %9 {offsets = [0, 512], sizes = [8, 512], strides = [1, 1]} : vector<8x1024xbf16> to vector<8x512xbf16>
    %c0_6 = arith.constant 0 : index
    %c0_7 = arith.constant 0 : index
    %12 = vector.load %arg3[%c0_6, %c0_7] : memref<512x384xbf16, #tpu.memory_space<vmem>>, vector<512x384xbf16>
    %cst_8 = arith.constant dense<0.000000e+00> : vector<8x384xf32>
    %13 = tpu.matmul %10, %12, %cst_8 {dimension_numbers = #tpu.dot_dimension_numbers<[1], [0], [0], [1], [0, 0, 1, 1], [], []>} : vector<8x512xbf16>, vector<512x384xbf16>, vector<8x384xf32> -> vector<8x384xf32>
    %c0_9 = arith.constant 0 : index
    %c0_10 = arith.constant 0 : index
    %14 = vector.load %arg4[%c0_9, %c0_10] : memref<1x384xf32, #tpu.memory_space<vmem>>, vector<1x384xf32>
    %15 = vector.broadcast %14 : vector<1x384xf32> to vector<8x384xf32>
    %16 = arith.addf %13, %15 : vector<8x384xf32>
    %cst_11 = arith.constant 0.000000e+00 : f32
    %17 = vector.broadcast %cst_11 : f32 to vector<8x384xf32>
    %18 = arith.maximumf %16, %17 : vector<8x384xf32>
    %19 = arith.truncf %18 : vector<8x384xf32> to vector<8x384xbf16>
    %c0_12 = arith.constant 0 : index
    %c0_13 = arith.constant 0 : index
    %20 = vector.load %arg5[%c0_12, %c0_13] : memref<512x384xbf16, #tpu.memory_space<vmem>>, vector<512x384xbf16>
    %cst_14 = arith.constant dense<0.000000e+00> : vector<8x384xf32>
    %21 = tpu.matmul %11, %20, %cst_14 {dimension_numbers = #tpu.dot_dimension_numbers<[1], [0], [0], [1], [0, 0, 1, 1], [], []>} : vector<8x512xbf16>, vector<512x384xbf16>, vector<8x384xf32> -> vector<8x384xf32>
    %c0_15 = arith.constant 0 : index
    %c0_16 = arith.constant 0 : index
    %22 = vector.load %arg6[%c0_15, %c0_16] : memref<1x384xf32, #tpu.memory_space<vmem>>, vector<1x384xf32>
    %23 = vector.broadcast %22 : vector<1x384xf32> to vector<8x384xf32>
    %24 = arith.addf %21, %23 : vector<8x384xf32>
    %cst_17 = arith.constant 0.000000e+00 : f32
    %25 = vector.broadcast %cst_17 : f32 to vector<8x384xf32>
    %26 = arith.maximumf %24, %25 : vector<8x384xf32>
    %27 = arith.truncf %26 : vector<8x384xf32> to vector<8x384xbf16>
    %c0_18 = arith.constant 0 : index
    %c0_19 = arith.constant 0 : index
    %28 = vector.load %arg7[%c0_18, %c0_19] : memref<384x2xbf16, #tpu.memory_space<vmem>>, vector<384x2xbf16>
    %cst_20 = arith.constant dense<0.000000e+00> : vector<8x2xf32>
    %29 = tpu.matmul %19, %28, %cst_20 {dimension_numbers = #tpu.dot_dimension_numbers<[1], [0], [0], [1], [0, 0, 1, 1], [], []>} : vector<8x384xbf16>, vector<384x2xbf16>, vector<8x2xf32> -> vector<8x2xf32>
    %c0_21 = arith.constant 0 : index
    %c0_22 = arith.constant 0 : index
    %30 = vector.load %arg8[%c0_21, %c0_22] : memref<384x2xbf16, #tpu.memory_space<vmem>>, vector<384x2xbf16>
    %cst_23 = arith.constant dense<0.000000e+00> : vector<8x2xf32>
    %31 = tpu.matmul %27, %30, %cst_23 {dimension_numbers = #tpu.dot_dimension_numbers<[1], [0], [0], [1], [0, 0, 1, 1], [], []>} : vector<8x384xbf16>, vector<384x2xbf16>, vector<8x2xf32> -> vector<8x2xf32>
    %32 = arith.addf %29, %31 : vector<8x2xf32>
    %c0_24 = arith.constant 0 : index
    %c0_25 = arith.constant 0 : index
    %33 = vector.load %arg9[%c0_24, %c0_25] : memref<1x2xf32, #tpu.memory_space<vmem>>, vector<1x2xf32>
    %34 = vector.broadcast %33 : vector<1x2xf32> to vector<8x2xf32>
    %35 = arith.addf %32, %34 : vector<8x2xf32>
    %c0_26 = arith.constant 0 : index
    %c0_27 = arith.constant 0 : index
    %36 = vector.load %arg10[%c0_26, %c0_27] : memref<8x2xf32, #tpu.memory_space<vmem>>, vector<8x2xf32>
    tpu.vector_store %arg10[%c0_26, %c0_27], %35 {strides = array<i32>} : memref<8x2xf32, #tpu.memory_space<vmem>>, vector<8x2xf32>,
    return
  }
}

</mosaic_0001>

<bundles_post_ra>
// kernel: q_critic_forward.1
= control target key start
LH: loop header
LB: loop body
LE: loop exit
PB: predicated region body
PF: predicated region fallthrough
CT: control target
= control target key end

     0   :  { %15 = vsyncpa [#allocation3], 0  ;;  %s3697_s0 = inlined_call_operand.vmem [shape: f32[8,16], index: 0, kind: input, shape index: {}]   ;;  %s3698_s1 = inlined_call_operand.vmem [shape: bf16[16,1024], index: 1, kind: input, shape index: {}]   ;;  %s3699_s2 = inlined_call_operand.vmem [shape: f32[1,1024], index: 2, kind: input, shape index: {}]   ;;  %s3700_s3 = inlined_call_operand.hbm [shape: bf16[512,384], index: 3, kind: input, shape index: {}]   ;;  %s3701_s4 = inlined_call_operand.vmem [shape: f32[1,384], index: 4, kind: input, shape index: {}]   ;;  %s3702_s5 = inlined_call_operand.hbm [shape: bf16[512,384], index: 5, kind: input, shape index: {}]   ;;  %s3703_s6 = inlined_call_operand.vmem [shape: f32[1,384], index: 6, kind: input, shape index: {}]   ;;  %s3704_s7 = inlined_call_operand.vmem [shape: bf16[384,2], index: 7, kind: input, shape index: {}]   ;;  %s3705_s8 = inlined_call_operand.vmem [shape: bf16[384,2], index: 8, kind: input, shape index: {}]   ;;  %s3706_s9 = inlined_call_operand.vmem [shape: f32[1,2], index: 9, kind: input, shape index: {}]   ;;  %s3707_s10 = inlined_call_operand.vmem [shape: f32[8,2], index: 10, kind: output, shape index: {}]  }
   0x1   :  { %16 = vsyncpa [#allocation5], 0  ;;  %s3348_s13 = smov [#allocation2]  }
   0x2   :  { %s28_s14 = sshll.u32 %s3348_s13, 4  ;;  %s29_s14 = int_to_ptr.vmem [resolvable:$true] %s28_s14 }
   0x3   :  { %s3312_s15 = scalar_lea.vmem %s29_s14, 12288  ;;  %p3317_p1 = scmp.lt.s32.totalorder %s29_s14, %s29_s14 }
   0x4   :  { %p3313_p0 = scmp.ne.s32.totalorder %s29_s14, %s3312_s15  ;;  %p3318_p2 = scmp.lt.s32.totalorder %s3312_s15, %s3312_s15 }
   0x6   :  { %p3319_p3 = por %p3318_p2, %p3317_p1 }
   0x8   :  { %p3320_p4 = pnand %p3319_p3, %p3313_p0 }
   0xa   :  { %3323 = shalt.err (!%p3320_p4)
}
   0xb   :  { %s3349_s16 = smov 192   ;;  %s3350_s17 = smov 12  }
   0xc   :  { %34 = dma.hbm_to_vmem [thread:$0]  %s3700_s3, 12288, %s29_s14, [#allocation3], %s3349_s16, %s3349_s16, %s3350_s17  }
   0xd   :  { %s3351_s20 = smov [#allocation4]  }
   0xe   :  { %s42_s21 = sshll.u32 %s3351_s20, 4  ;;  %s43_s21 = int_to_ptr.vmem [resolvable:$true] %s42_s21 }
   0xf   :  { %s3332_s22 = scalar_lea.vmem %s43_s21, 12288  ;;  %p3337_p6 = scmp.lt.s32.totalorder %s43_s21, %s43_s21 }
  0x10   :  { %p3333_p5 = scmp.ne.s32.totalorder %s43_s21, %s3332_s22  ;;  %p3338_p7 = scmp.lt.s32.totalorder %s3332_s22, %s3332_s22 }
  0x12   :  { %p3339_p8 = por %p3338_p7, %p3337_p6 }
  0x14   :  { %p3340_p9 = pnand %p3339_p8, %p3333_p5 }
  0x16   :  { %3343 = shalt.err (!%p3340_p9)
}
  0x17   :  { %48 = dma.hbm_to_vmem [thread:$0]  %s3702_s5, 12288, %s43_s21, [#allocation5], %s3349_s16, %s3349_s16, %s3350_s17  }
  0x18   :  { %3344 = dma.done.wait [#allocation3], 12288  }
  0x19   :  { %3345 = vsyncadd [#allocation3], 4294955008 }
  0x1a   :  { %3346 = dma.done.wait [#allocation5], 12288  }
  0x1b   :  { %3347 = vsyncadd [#allocation5], 4294955008  ;;  %v3352_v0 = vmov 0   ;;  %v66_v1 = vld [vmem:[%s3698_s1] sm:$0xff]  ;;  %v67_v3 = vld [vmem:[%s3698_s1 + $0x8] sm:$0xff]  ;;  %vm156_vm0 = vcmask 130048  }
  0x1c   :  { %192 = vmatprep.mubr.bf16.mxu0 %v3352_v0  ;;  %233 = vmatprep.mubr.bf16.mxu1 %v3352_v0  ;;  %v70_v2 = vld [vmem:[%s3698_s1 + $0x20] sm:$0xff]  ;;  %v71_v5 = vld [vmem:[%s3698_s1 + $0x28] sm:$0xff]  ;;  %v68_v8 = vld [vmem:[%s3698_s1 + $0x10] sm:$0xff]  ;;  %vm3354_vm1 = vmmov 0   ;;  %vm2542_vm2 = vcmask 15360  }
  0x1d   :  { %v2551_v4 = vcombine.high %v66_v1, %v70_v2  ;;  %v2550_v6 = vcombine.low %v66_v1, %v70_v2  ;;  %v64_v7 = vld [vmem:[%s3697_s0] sm:$0xff]  ;;  %v2553_v9 = vcombine.high %v67_v3, %v71_v5  ;;  %v2552_v10 = vcombine.low %v67_v3, %v71_v5  ;;  %v72_v11 = vld [vmem:[%s3698_s1 + $0x30] sm:$0xff]  ;;  %v69_v12 = vld [vmem:[%s3698_s1 + $0x18] sm:$0xff] }
  0x1e   :  { %v73_v13 = vld [vmem:[%s3698_s1 + $0x38] sm:$0xff]  ;;  %v65_v14 = vpack.c.bf16 %v64_v7, %v64_v7  ;;  %v2555_v15 = vcombine.high %v68_v8, %v72_v11  ;;  %v2554_v17 = vcombine.low %v68_v8, %v72_v11  ;;  %v3000_v21 = vld [vmem:[#allocation2 + $0xa8] ss:$12 sps:$4 sm:$0xff]   ;;  %v3020_v31 = vld [vmem:[#allocation2 + $0x64] ss:$12 sps:$4 sm:$0xff]  }
  0x1f   :  { %174 = vmatprep.subr.bf16.mxu0 %v2551_v4  ;;  %v2557_v16 = vcombine.high %v69_v12, %v73_v13  ;;  %215 = vmatprep.subr.bf16.mxu1 %v2553_v9  ;;  %v2556_v18 = vcombine.low %v69_v12, %v73_v13  ;;  %v3002_v19 = vld [vmem:[#allocation2 + $0xac] ss:$12 sps:$4 sm:$0xff]   ;;  %v3003_v22 = vld [vmem:[#allocation2 + $0x228] ss:$12 sps:$4 sm:$0xff]   ;;  %v3006_v25 = vld [vmem:[#allocation2 + $0x90] ss:$12 sps:$4 sm:$0xff]  }
  0x20   :  { %175 = vmatpush1.bf16.msra.mxu0 %v2550_v6  ;;  %216 = vmatpush1.bf16.msra.mxu1 %v2552_v10  ;;  %v3005_v20 = vld [vmem:[#allocation2 + $0x22c] ss:$12 sps:$4 sm:$0xff]   ;;  %v3008_v23 = vld [vmem:[#allocation2 + $0x94] ss:$12 sps:$4 sm:$0xff]   ;;  %v3009_v26 = vld [vmem:[#allocation2 + $0x210] ss:$12 sps:$4 sm:$0xff]  }
  0x21   :  { %256 = vmatprep.subr.bf16.mxu0 %v2555_v15  ;;  %297 = vmatprep.subr.bf16.mxu1 %v2557_v16  ;;  %v3011_v24 = vld [vmem:[#allocation2 + $0x214] ss:$12 sps:$4 sm:$0xff]   ;;  %v3014_v27 = vld [vmem:[#allocation2 + $0x7c] ss:$12 sps:$4 sm:$0xff]   ;;  %v3012_v29 = vld [vmem:[#allocation2 + $0x78] ss:$12 sps:$4 sm:$0xff]  }
  0x22   :  { %v3017_v28 = vld [vmem:[#allocation2 + $0x1fc] ss:$12 sps:$4 sm:$0xff]   ;;  %v3015_v30 = vld [vmem:[#allocation2 + $0x1f8] ss:$12 sps:$4 sm:$0xff]   ;;  %v3018_v33 = vld [vmem:[#allocation2 + $0x60] ss:$12 sps:$4 sm:$0xff]  }
  0x23   :  { %2558 = vmatmul.mubr.msk.bf16.vlgmr.msra.gmra.mxu0 %vm156_vm0, %v65_v14  ;;  %2559 = vmatmul.mubr.msk.bf16.vlgmr.msra.gmra.mxu1 %vm156_vm0, %v65_v14  ;;  %v3023_v32 = vld [vmem:[#allocation2 + $0x1e4] ss:$12 sps:$4 sm:$0xff]   ;;  %v3021_v34 = vld [vmem:[#allocation2 + $0x1e0] ss:$12 sps:$4 sm:$0xff]   ;;  %v3024_v37 = vld [vmem:[#allocation2 + $0x48] ss:$12 sps:$4 sm:$0xff]  }
  0x24   :  { %257 = vmatpush1.bf16.msra.mxu0 %v2554_v17  ;;  %274 = vmatprep.mubr.bf16.mxu0 %v3352_v0  ;;  %v3026_v35 = vld [vmem:[#allocation2 + $0x4c] ss:$12 sps:$4 sm:$0xff]   ;;  %v3027_v38 = vld [vmem:[#allocation2 + $0x1c8] ss:$12 sps:$4 sm:$0xff]   ;;  %v3030_v41 = vld [vmem:[#allocation2 + $0x30] ss:$12 sps:$4 sm:$0xff]  }
  0x25   :  { %298 = vmatpush1.bf16.msra.mxu1 %v2556_v18  ;;  %315 = vmatprep.mubr.bf16.mxu1 %v3352_v0  ;;  %v3029_v36 = vld [vmem:[#allocation2 + $0x1cc] ss:$12 sps:$4 sm:$0xff]   ;;  %v3032_v39 = vld [vmem:[#allocation2 + $0x34] ss:$12 sps:$4 sm:$0xff]   ;;  %v3033_v42 = vld [vmem:[#allocation2 + $0x1b0] ss:$12 sps:$4 sm:$0xff]  }
  0x26   :  { %997 = vmatprep.subr.bf16.mxu0 %v3002_v19  ;;  %1038 = vmatprep.subr.bf16.mxu1 %v3005_v20  ;;  %v3035_v40 = vld [vmem:[#allocation2 + $0x1b4] ss:$12 sps:$4 sm:$0xff]   ;;  %v3038_v43 = vld [vmem:[#allocation2 + $0x1c] ss:$12 sps:$4 sm:$0xff]   ;;  %v3036_v45 = vld [vmem:[#allocation2 + $0x18] ss:$12 sps:$4 sm:$0xff]  }
  0x27   :  { %v3041_v44 = vld [vmem:[#allocation2 + $0x19c] ss:$12 sps:$4 sm:$0xff]   ;;  %v3039_v46 = vld [vmem:[#allocation2 + $0x198] ss:$12 sps:$4 sm:$0xff]   ;;  %v3042_v48 = vld [vmem:[#allocation2] ss:$12 sps:$4 sm:$0xff]  }
  0x28   :  { %v3044_v47 = vld [vmem:[#allocation2 + $0x4] ss:$12 sps:$4 sm:$0xff]   ;;  %v3045_v50 = vld [vmem:[#allocation2 + $0x180] ss:$12 sps:$4 sm:$0xff]   ;;  %v3048_v53 = vld [vmem:[#allocation2 + $0x168] ss:$12 sps:$4 sm:$0xff]  }
  0x29   :  { %v3047_v49 = vld [vmem:[#allocation2 + $0x184] ss:$12 sps:$4 sm:$0xff]   ;;  %v3050_v51 = vld [vmem:[#allocation2 + $0x16c] ss:$12 sps:$4 sm:$0xff]   ;;  %v3051_v54 = vld [vmem:[#allocation2 + $0x2e8] ss:$12 sps:$4 sm:$0xff]  }
  0x2a   :  { %v3053_v52 = vld [vmem:[#allocation2 + $0x2ec] ss:$12 sps:$4 sm:$0xff]   ;;  %v3056_v55 = vld [vmem:[#allocation2 + $0x154] ss:$12 sps:$4 sm:$0xff]   ;;  %v3054_v57 = vld [vmem:[#allocation2 + $0x150] ss:$12 sps:$4 sm:$0xff]  }
  0x2b   :  { %2560 = vmatmul.mubr.msk.bf16.vlgmr.msra.gmra.mxu0 %vm156_vm0, %v65_v14  ;;  %2561 = vmatmul.mubr.msk.bf16.vlgmr.msra.gmra.mxu1 %vm156_vm0, %v65_v14  ;;  %v3059_v56 = vld [vmem:[#allocation2 + $0x2d4] ss:$12 sps:$4 sm:$0xff]   ;;  %v3057_v58 = vld [vmem:[#allocation2 + $0x2d0] ss:$12 sps:$4 sm:$0xff]   ;;  %v3060_v61 = vld [vmem:[#allocation2 + $0x138] ss:$12 sps:$4 sm:$0xff]  }
  0x2c   :  { %998 = vmatpush1.bf16.msra.mxu0 %v3000_v21  ;;  %1039 = vmatpush1.bf16.msra.mxu1 %v3003_v22  ;;  %v3062_v59 = vld [vmem:[#allocation2 + $0x13c] ss:$12 sps:$4 sm:$0xff]   ;;  %v3063_v62 = vld [vmem:[#allocation2 + $0x2b8] ss:$12 sps:$4 sm:$0xff]   ;;  %v3066_v1 = vld [vmem:[#allocation2 + $0x120] ss:$12 sps:$4 sm:$0xff]   ;;  %v76_v21 = vlaneseq }
  0x2d   :  { %999 = vmatprep.subr.bf16.mxu0 %v3008_v23  ;;  %1040 = vmatprep.subr.bf16.mxu1 %v3011_v24  ;;  %v3065_v60 = vld [vmem:[#allocation2 + $0x2bc] ss:$12 sps:$4 sm:$0xff]   ;;  %v3068_v63 = vld [vmem:[#allocation2 + $0x124] ss:$12 sps:$4 sm:$0xff]   ;;  %v3069_v2 = vld [vmem:[#allocation2 + $0x2a0] ss:$12 sps:$4 sm:$0xff]  }
  0x2e   :  { %v3071_v0 = vld [vmem:[#allocation2 + $0x2a4] ss:$12 sps:$4 sm:$0xff]   ;;  %v3074_v3 = vld [vmem:[#allocation2 + $0x10c] ss:$12 sps:$4 sm:$0xff]   ;;  %v3072_v5 = vld [vmem:[#allocation2 + $0x108] ss:$12 sps:$4 sm:$0xff]  }
  0x2f   :  { %v3077_v4 = vld [vmem:[#allocation2 + $0x28c] ss:$12 sps:$4 sm:$0xff]   ;;  %v3075_v6 = vld [vmem:[#allocation2 + $0x288] ss:$12 sps:$4 sm:$0xff]   ;;  %v3078_v9 = vld [vmem:[#allocation2 + $0xf0] ss:$12 sps:$4 sm:$0xff]  }
  0x30   :  { %1000 = vmatpush1.bf16.msra.mxu0 %v3006_v25  ;;  %1041 = vmatpush1.bf16.msra.mxu1 %v3009_v26  ;;  %v3080_v7 = vld [vmem:[#allocation2 + $0xf4] ss:$12 sps:$4 sm:$0xff]   ;;  %v3081_v10 = vld [vmem:[#allocation2 + $0x270] ss:$12 sps:$4 sm:$0xff]   ;;  %v3084_v13 = vld [vmem:[#allocation2 + $0xd8] ss:$12 sps:$4 sm:$0xff]  }
  0x31   :  { %1001 = vmatprep.subr.bf16.mxu0 %v3014_v27  ;;  %1042 = vmatprep.subr.bf16.mxu1 %v3017_v28  ;;  %v3083_v8 = vld [vmem:[#allocation2 + $0x274] ss:$12 sps:$4 sm:$0xff]   ;;  %v3086_v11 = vld [vmem:[#allocation2 + $0xdc] ss:$12 sps:$4 sm:$0xff]   ;;  %v3087_v14 = vld [vmem:[#allocation2 + $0x258] ss:$12 sps:$4 sm:$0xff]  }
  0x32   :  { %v3089_v12 = vld [vmem:[#allocation2 + $0x25c] ss:$12 sps:$4 sm:$0xff]   ;;  %v3092_v15 = vld [vmem:[#allocation2 + $0xc4] ss:$12 sps:$4 sm:$0xff]   ;;  %v3090_v17 = vld [vmem:[#allocation2 + $0xc0] ss:$12 sps:$4 sm:$0xff]  }
  0x33   :  { %v3095_v16 = vld [vmem:[#allocation2 + $0x244] ss:$12 sps:$4 sm:$0xff]   ;;  %v3093_v18 = vld [vmem:[#allocation2 + $0x240] ss:$12 sps:$4 sm:$0xff]   ;;  %v3447_v22 = vshrl.u32 %v76_v21, 7 }
  0x34   :  { %1002 = vmatpush1.bf16.msra.mxu0 %v3012_v29  ;;  %1043 = vmatpush1.bf16.msra.mxu1 %v3015_v30  ;;  %v3096_v19 = vld [vmem:[#allocation2 + $0x170] ss:$12 sps:$4 sm:$0xff]   ;;  %v3455_v24 = vld [vmem:[%s3699_s2] sm:$0xff] }
  0x35   :  { %1003 = vmatprep.subr.bf16.mxu0 %v3020_v31  ;;  %1044 = vmatprep.subr.bf16.mxu1 %v3023_v32  ;;  %v3097_v20 = vld [vmem:[#allocation2 + $0x2f0] ss:$12 sps:$4 sm:$0xff]   ;;  %v3450_v23 = vsub.s32 0, %v3447_v22  ;;  %v3458_v25 = vsub.s32 2, %v3447_v22  ;;  %v3461_v26 = vsub.s32 1, %v3447_v22  ;;  %v90_v27 = vsub.s32 3, %v3447_v22 }
  0x36   :  { %v3121_v21 = vld [vmem:[#allocation2 + $0x260] ss:$12 sps:$4 sm:$0xff]  }
  0x37   :  { %v79_v28 = vrot.slane %v3455_v24, %v3450_v23  ;;  %v87_v29 = vrot.slane %v3455_v24, %v3458_v25  ;;  %v83_v30 = vrot.slane %v3455_v24, %v3461_v26  ;;  %v91_v32 = vrot.slane %v3455_v24, %v90_v27 }
  0x38   :  { %1004 = vmatpush1.bf16.msra.mxu0 %v3018_v33  ;;  %1045 = vmatpush1.bf16.msra.mxu1 %v3021_v34 }
  0x39   :  { %1005 = vmatprep.subr.bf16.mxu0 %v3026_v35  ;;  %1046 = vmatprep.subr.bf16.mxu1 %v3029_v36 }
  0x3c   :  { %1006 = vmatpush1.bf16.msra.mxu0 %v3024_v37  ;;  %1047 = vmatpush1.bf16.msra.mxu1 %v3027_v38 }
  0x3d   :  { %1007 = vmatprep.subr.bf16.mxu0 %v3032_v39  ;;  %1048 = vmatprep.subr.bf16.mxu1 %v3035_v40 }
  0x40   :  { %1008 = vmatpush1.bf16.msra.mxu0 %v3030_v41  ;;  %1049 = vmatpush1.bf16.msra.mxu1 %v3033_v42 }
  0x41   :  { %1009 = vmatprep.subr.bf16.mxu0 %v3038_v43  ;;  %1050 = vmatprep.subr.bf16.mxu1 %v3041_v44 }
  0x44   :  { %1010 = vmatpush1.bf16.msra.mxu0 %v3036_v45  ;;  %1051 = vmatpush1.bf16.msra.mxu1 %v3039_v46 }
  0x45   :  { %1011 = vmatprep.subr.bf16.mxu0 %v3044_v47  ;;  %1052 = vmatprep.subr.bf16.mxu1 %v3047_v49 }
  0x48   :  { %1012 = vmatpush1.bf16.msra.mxu0 %v3042_v48  ;;  %1053 = vmatpush1.bf16.msra.mxu1 %v3045_v50  ;;  %v3098_v50 = vld [vmem:[#allocation2 + $0xb0] ss:$12 sps:$4 sm:$0xff]  }
  0x49   :  { %1013 = vmatprep.subr.bf16.mxu0 %v3050_v51  ;;  %1054 = vmatprep.subr.bf16.mxu1 %v3053_v52 }
  0x4c   :  { %1014 = vmatpush2.bf16.msra.mxu0 %v3048_v53  ;;  %1055 = vmatpush2.bf16.msra.mxu1 %v3051_v54  ;;  %v3099_v53 = vld [vmem:[#allocation2 + $0x230] ss:$12 sps:$4 sm:$0xff]  }
  0x4d   :  { %1015 = vmatprep.subr.bf16.mxu0 %v3056_v55  ;;  %1056 = vmatprep.subr.bf16.mxu1 %v3059_v56  ;;  %v3100_v55 = vld [vmem:[#allocation2 + $0x158] ss:$12 sps:$4 sm:$0xff]  }
  0x50   :  { %1016 = vmatpush2.bf16.msra.mxu0 %v3054_v57  ;;  %1057 = vmatpush2.bf16.msra.mxu1 %v3057_v58  ;;  %v3101_v57 = vld [vmem:[#allocation2 + $0x2d8] ss:$12 sps:$4 sm:$0xff]  }
  0x51   :  { %1017 = vmatprep.subr.bf16.mxu0 %v3062_v59  ;;  %1058 = vmatprep.subr.bf16.mxu1 %v3065_v60  ;;  %v3102_v59 = vld [vmem:[#allocation2 + $0x98] ss:$12 sps:$4 sm:$0xff]  }
  0x54   :  { %1018 = vmatpush2.bf16.msra.mxu0 %v3060_v61  ;;  %1059 = vmatpush2.bf16.msra.mxu1 %v3063_v62  ;;  %v3103_v61 = vld [vmem:[#allocation2 + $0x218] ss:$12 sps:$4 sm:$0xff]   ;;  %v3104_v62 = vld [vmem:[#allocation2 + $0x140] ss:$12 sps:$4 sm:$0xff]  }
  0x55   :  { %1019 = vmatprep.subr.bf16.mxu0 %v3068_v63  ;;  %1060 = vmatprep.subr.bf16.mxu1 %v3071_v0  ;;  %v3105_v0 = vld [vmem:[#allocation2 + $0x2c0] ss:$12 sps:$4 sm:$0xff]  }
  0x58   :  { %1020 = vmatpush2.bf16.msra.mxu0 %v3066_v1  ;;  %1061 = vmatpush2.bf16.msra.mxu1 %v3069_v2 }
  0x59   :  { %1021 = vmatprep.subr.bf16.mxu0 %v3074_v3  ;;  %1062 = vmatprep.subr.bf16.mxu1 %v3077_v4  ;;  %v3106_v3 = vld [vmem:[#allocation2 + $0x80] ss:$12 sps:$4 sm:$0xff]  }
  0x5c   :  { %1022 = vmatpush2.bf16.msra.mxu0 %v3072_v5  ;;  %1063 = vmatpush2.bf16.msra.mxu1 %v3075_v6  ;;  %v3107_v5 = vld [vmem:[#allocation2 + $0x200] ss:$12 sps:$4 sm:$0xff]   ;;  %v3108_v6 = vld [vmem:[#allocation2 + $0x128] ss:$12 sps:$4 sm:$0xff]  }
  0x5d   :  { %1023 = vmatprep.subr.bf16.mxu0 %v3080_v7  ;;  %1064 = vmatprep.subr.bf16.mxu1 %v3083_v8  ;;  %v3109_v7 = vld [vmem:[#allocation2 + $0x2a8] ss:$12 sps:$4 sm:$0xff]  }
  0x5e   :  { %v3110_v8 = vld [vmem:[#allocation2 + $0x68] ss:$12 sps:$4 sm:$0xff]  }
  0x60   :  { %1024 = vmatpush2.bf16.msra.mxu0 %v3078_v9  ;;  %1065 = vmatpush2.bf16.msra.mxu1 %v3081_v10  ;;  %v3111_v9 = vld [vmem:[#allocation2 + $0x1e8] ss:$12 sps:$4 sm:$0xff]   ;;  %v3112_v10 = vld [vmem:[#allocation2 + $0x110] ss:$12 sps:$4 sm:$0xff]  }
  0x61   :  { %1025 = vmatprep.subr.bf16.mxu0 %v3086_v11  ;;  %1066 = vmatprep.subr.bf16.mxu1 %v3089_v12  ;;  %v3113_v11 = vld [vmem:[#allocation2 + $0x290] ss:$12 sps:$4 sm:$0xff]  }
  0x62   :  { %v3114_v12 = vld [vmem:[#allocation2 + $0x50] ss:$12 sps:$4 sm:$0xff]  }
  0x64   :  { %1026 = vmatpush2.bf16.msra.mxu0 %v3084_v13  ;;  %1067 = vmatpush2.bf16.msra.mxu1 %v3087_v14  ;;  %v3115_v13 = vld [vmem:[#allocation2 + $0x1d0] ss:$12 sps:$4 sm:$0xff]   ;;  %v3116_v14 = vld [vmem:[#allocation2 + $0xf8] ss:$12 sps:$4 sm:$0xff]  }
  0x65   :  { %1027 = vmatprep.subr.bf16.mxu0 %v3092_v15  ;;  %1068 = vmatprep.subr.bf16.mxu1 %v3095_v16  ;;  %v3117_v15 = vld [vmem:[#allocation2 + $0x278] ss:$12 sps:$4 sm:$0xff]   ;;  %v98_v16 = vsub.s32 5, %v3447_v22 }
  0x67   :  { %v99_v27 = vrot.slane %v3455_v24, %v98_v16  ;;  %v3187_v16 = vld [vmem:[#allocation4 + $0x2d4] ss:$12 sps:$4 sm:$0xff]  }
  0x68   :  { %1028 = vmatpush2.bf16.msra.mxu0 %v3090_v17  ;;  %1069 = vmatpush2.bf16.msra.mxu1 %v3093_v18  ;;  %v106_v17 = vsub.s32 7, %v3447_v22  ;;  %v3118_v18 = vld [vmem:[#allocation2 + $0x38] ss:$12 sps:$4 sm:$0xff]  }
  0x69   :  { %2803 = vmatprep.subr.bf16.mxu0 %v3096_v19  ;;  %2825 = vmatprep.subr.bf16.mxu1 %v3097_v20  ;;  %v3119_v19 = vld [vmem:[#allocation2 + $0x1b8] ss:$12 sps:$4 sm:$0xff]   ;;  %v3120_v20 = vld [vmem:[#allocation2 + $0xe0] ss:$12 sps:$4 sm:$0xff]  }
  0xe3   :  { %v194_v31 = vpop.f32.mrf.mxu0  ;;  %v235_v34 = vpop.f32.mrf.mxu1 }
  0xe4   :  { %v195_v33 = vadd.f32 %v194_v31, %v79_v28  ;;  %v236_v35 = vadd.f32 %v235_v34, %v87_v29  ;;  %v107_v28 = vrot.slane %v3455_v24, %v106_v17  ;;  %v3122_v29 = vld [vmem:[#allocation2 + $0x20] ss:$12 sps:$4 sm:$0xff]   ;;  %v3124_v31 = vld [vmem:[#allocation2 + $0xc8] ss:$12 sps:$4 sm:$0xff]   ;;  %v3182_v17 = vld [vmem:[#allocation4 + $0x150] ss:$12 sps:$4 sm:$0xff]  }
  0xe5   :  { %v196_v36 = vpop.f32.mrf.mxu0  ;;  %v237_v38 = vpop.f32.mrf.mxu1 }
  0xe6   :  { %v197_v37 = vadd.f32 %v196_v36, %v83_v30  ;;  %v324_v39 = vmax.f32 %v195_v33, 0.0  ;;  %v326_v40 = vmax.f32 %v236_v35, 0.0  ;;  %v238_v41 = vadd.f32 %v237_v38, %v91_v32  ;;  %v3123_v30 = vld [vmem:[#allocation2 + $0x1a0] ss:$12 sps:$4 sm:$0xff]   ;;  %v3125_v32 = vld [vmem:[#allocation2 + $0x248] ss:$12 sps:$4 sm:$0xff]  }
  0xe7   :  { %v198_v42 = vpop.f32.mrf.mxu0  ;;  %v239_v44 = vpop.f32.mrf.mxu1  ;;  %v3126_v35 = vld [vmem:[#allocation2 + $0x8] ss:$12 sps:$4 sm:$0xff]   ;;  %v3133_v38 = vld [vmem:[#allocation4 + $0x22c] ss:$12 sps:$4 sm:$0xff]  }
  0xe8   :  { %v325_v43 = vmax.f32 %v197_v37, 0.0  ;;  %v327_v45 = vmax.f32 %v238_v41, 0.0  ;;  %v3471_v47 = vpack.c.bf16 %v326_v40, %v326_v40  ;;  %v3473_v51 = vpack.c.bf16 %v324_v39, %v324_v39  ;;  %v3127_v36 = vld [vmem:[#allocation2 + $0x188] ss:$12 sps:$4 sm:$0xff]   ;;  %v3130_v37 = vld [vmem:[#allocation4 + $0xac] ss:$12 sps:$4 sm:$0xff]  }
  0xe9   :  { %v199_v46 = vpop.f32.mrf.mxu0  ;;  %v240_v49 = vpop.f32.mrf.mxu1  ;;  %v3128_v41 = vld [vmem:[#allocation4 + $0xa8] ss:$12 sps:$4 sm:$0xff]  }
  0xea   :  { %v333_v48 = vpack.c.bf16 %v325_v43, %v325_v43  ;;  %v335_v52 = vpack.c.bf16 %v327_v45, %v327_v45  ;;  %v3131_v42 = vld [vmem:[#allocation4 + $0x228] ss:$12 sps:$4 sm:$0xff]   ;;  %v3137_v49 = vld [vmem:[#allocation4 + $0x210] ss:$12 sps:$4 sm:$0xff]  }
  0xeb   :  { %v3475_v54 = vpop.f32.mrf.mxu0  ;;  %v3477_v56 = vpop.f32.mrf.mxu1  ;;  %v3136_v43 = vld [vmem:[#allocation4 + $0x94] ss:$12 sps:$4 sm:$0xff]  }
  0xec   :  { %1029 = vmatprep.mubr.bf16.mxu0 %v333_v48  ;;  %1070 = vmatprep.mubr.bf16.mxu1 %v335_v52  ;;  %v3139_v44 = vld [vmem:[#allocation4 + $0x214] ss:$12 sps:$4 sm:$0xff]  }
  0xed   :  { %1030 = vmatmul.mubr.bf16.vlgmr.msra.gmra.mxu0 %v3473_v51  ;;  %v278_v58 = vpop.f32.mrf.mxu0  ;;  %1071 = vmatmul.mubr.bf16.vlgmr.msra.gmra.mxu1 %v3471_v47  ;;  %v319_v60 = vpop.f32.mrf.mxu1 }
  0xee   :  { %2804 = vmatpush3.bf16.msra.mxu0 %v3098_v50  ;;  %2826 = vmatpush3.bf16.msra.mxu1 %v3099_v53  ;;  %v279_v33 = vadd.f32 %v278_v58, %v99_v27  ;;  %v320_v34 = vadd.f32 %v319_v60, %v107_v28  ;;  %v3142_v50 = vld [vmem:[#allocation4 + $0x7c] ss:$12 sps:$4 sm:$0xff]   ;;  %v3140_v53 = vld [vmem:[#allocation4 + $0x78] ss:$12 sps:$4 sm:$0xff]   ;;  %v3149_v58 = vld [vmem:[#allocation4 + $0x1e0] ss:$12 sps:$4 sm:$0xff]  }
  0xef   :  { %1111 = vmatprep.mubr.bf16.mxu0 %v333_v48  ;;  %v280_v63 = vpop.f32.mrf.mxu0  ;;  %1151 = vmatprep.mubr.bf16.mxu1 %v335_v52  ;;  %v321_v1 = vpop.f32.mrf.mxu1  ;;  %v3134_v48 = vld [vmem:[#allocation4 + $0x90] ss:$12 sps:$4 sm:$0xff]   ;;  %v3157_v60 = vld [vmem:[#allocation4 + $0x1cc] ss:$12 sps:$4 sm:$0xff]  }
  0xf0   :  { %2805 = vmatprep.subr.bf16.mxu0 %v3100_v55  ;;  %2827 = vmatprep.subr.bf16.mxu1 %v3101_v57  ;;  %v329_v39 = vmax.f32 %v279_v33, 0.0  ;;  %v331_v40 = vmax.f32 %v320_v34, 0.0  ;;  %v3145_v52 = vld [vmem:[#allocation4 + $0x1fc] ss:$12 sps:$4 sm:$0xff]   ;;  %v3148_v55 = vld [vmem:[#allocation4 + $0x64] ss:$12 sps:$4 sm:$0xff]  }
  0xf1   :  { %v281_v2 = vpop.f32.mrf.mxu0  ;;  %v322_v4 = vpop.f32.mrf.mxu1  ;;  %v3146_v57 = vld [vmem:[#allocation4 + $0x60] ss:$12 sps:$4 sm:$0xff]   ;;  %v3158_v1 = vld [vmem:[#allocation4 + $0x30] ss:$12 sps:$4 sm:$0xff]   ;;  %v3191_v27 = vld [vmem:[#allocation4 + $0x2b8] ss:$12 sps:$4 sm:$0xff]  }
  0xf2   :  { %2806 = vmatpush3.bf16.msra.mxu0 %v3102_v59  ;;  %2828 = vmatpush3.bf16.msra.mxu1 %v3103_v61  ;;  %v3485_v45 = vpack.c.bf16 %v329_v39, %v329_v39  ;;  %v3488_v46 = vpack.c.bf16 %v331_v40, %v331_v40  ;;  %v3154_v59 = vld [vmem:[#allocation4 + $0x4c] ss:$12 sps:$4 sm:$0xff]   ;;  %v3152_v61 = vld [vmem:[#allocation4 + $0x48] ss:$12 sps:$4 sm:$0xff]   ;;  %v3161_v2 = vld [vmem:[#allocation4 + $0x1b0] ss:$12 sps:$4 sm:$0xff]  }
  0xf3   :  { %2807 = vmatprep.subr.bf16.mxu0 %v3104_v62  ;;  %2829 = vmatprep.subr.bf16.mxu1 %v3105_v0  ;;  %v3155_v62 = vld [vmem:[#allocation4 + $0x1c8] ss:$12 sps:$4 sm:$0xff]   ;;  %v3196_v28 = vld [vmem:[#allocation4 + $0x124] ss:$12 sps:$4 sm:$0xff]   ;;  %v3205_v33 = vld [vmem:[#allocation4 + $0x28c] ss:$12 sps:$4 sm:$0xff]  }
  0xf4   :  { %v3160_v63 = vld [vmem:[#allocation4 + $0x34] ss:$12 sps:$4 sm:$0xff]   ;;  %v3169_v4 = vld [vmem:[#allocation4 + $0x19c] ss:$12 sps:$4 sm:$0xff]  }
  0xf5   :  { %v3163_v0 = vld [vmem:[#allocation4 + $0x1b4] ss:$12 sps:$4 sm:$0xff]  }
  0xf6   :  { %2808 = vmatpush3.bf16.msra.mxu0 %v3106_v3  ;;  %2830 = vmatpush3.bf16.msra.mxu1 %v3107_v5  ;;  %v3166_v3 = vld [vmem:[#allocation4 + $0x1c] ss:$12 sps:$4 sm:$0xff]   ;;  %v3164_v5 = vld [vmem:[#allocation4 + $0x18] ss:$12 sps:$4 sm:$0xff]   ;;  %v3211_v39 = vld [vmem:[#allocation4 + $0x274] ss:$12 sps:$4 sm:$0xff]  }
  0xf7   :  { %2809 = vmatprep.subr.bf16.mxu0 %v3108_v6  ;;  %2831 = vmatprep.subr.bf16.mxu1 %v3109_v7  ;;  %v3167_v6 = vld [vmem:[#allocation4 + $0x198] ss:$12 sps:$4 sm:$0xff]   ;;  %v3200_v34 = vld [vmem:[#allocation4 + $0x108] ss:$12 sps:$4 sm:$0xff]  }
  0xf8   :  { %v3172_v7 = vld [vmem:[#allocation4 + $0x4] ss:$12 sps:$4 sm:$0xff]  }
  0xfa   :  { %2810 = vmatpush3.bf16.msra.mxu0 %v3110_v8  ;;  %2832 = vmatpush3.bf16.msra.mxu1 %v3111_v9  ;;  %v3175_v8 = vld [vmem:[#allocation4 + $0x184] ss:$12 sps:$4 sm:$0xff]   ;;  %v3170_v9 = vld [vmem:[#allocation4] ss:$12 sps:$4 sm:$0xff]  }
  0xfb   :  { %2811 = vmatprep.subr.bf16.mxu0 %v3112_v10  ;;  %2833 = vmatprep.subr.bf16.mxu1 %v3113_v11  ;;  %v3173_v10 = vld [vmem:[#allocation4 + $0x180] ss:$12 sps:$4 sm:$0xff]  }
  0xfc   :  { %v3178_v11 = vld [vmem:[#allocation4 + $0x16c] ss:$12 sps:$4 sm:$0xff]  }
  0xfe   :  { %2812 = vmatpush3.bf16.msra.mxu0 %v3114_v12  ;;  %2834 = vmatpush3.bf16.msra.mxu1 %v3115_v13  ;;  %v3181_v12 = vld [vmem:[#allocation4 + $0x2ec] ss:$12 sps:$4 sm:$0xff]   ;;  %v3176_v13 = vld [vmem:[#allocation4 + $0x168] ss:$12 sps:$4 sm:$0xff]  }
  0xff   :  { %2813 = vmatprep.subr.bf16.mxu0 %v3116_v14  ;;  %2835 = vmatprep.subr.bf16.mxu1 %v3117_v15  ;;  %v3179_v14 = vld [vmem:[#allocation4 + $0x2e8] ss:$12 sps:$4 sm:$0xff]  }
 0x100   :  { %v3184_v15 = vld [vmem:[#allocation4 + $0x154] ss:$12 sps:$4 sm:$0xff]  }
 0x102   :  { %2814 = vmatpush3.bf16.msra.mxu0 %v3118_v18  ;;  %2836 = vmatpush3.bf16.msra.mxu1 %v3119_v19  ;;  %v3185_v18 = vld [vmem:[#allocation4 + $0x2d0] ss:$12 sps:$4 sm:$0xff]  }
 0x103   :  { %2815 = vmatprep.subr.bf16.mxu0 %v3120_v20  ;;  %2837 = vmatprep.subr.bf16.mxu1 %v3121_v21  ;;  %v3190_v19 = vld [vmem:[#allocation4 + $0x13c] ss:$12 sps:$4 sm:$0xff]   ;;  %v3188_v21 = vld [vmem:[#allocation4 + $0x138] ss:$12 sps:$4 sm:$0xff]  }
 0x104   :  { %v3193_v20 = vld [vmem:[#allocation4 + $0x2bc] ss:$12 sps:$4 sm:$0xff]  }
 0x106   :  { %2816 = vmatpush3.bf16.msra.mxu0 %v3122_v29  ;;  %2838 = vmatpush3.bf16.msra.mxu1 %v3123_v30  ;;  %v3199_v29 = vld [vmem:[#allocation4 + $0x2a4] ss:$12 sps:$4 sm:$0xff]   ;;  %v3194_v30 = vld [vmem:[#allocation4 + $0x120] ss:$12 sps:$4 sm:$0xff]  }
 0x107   :  { %2817 = vmatprep.subr.bf16.mxu0 %v3124_v31  ;;  %2839 = vmatprep.subr.bf16.mxu1 %v3125_v32  ;;  %v3197_v31 = vld [vmem:[#allocation4 + $0x2a0] ss:$12 sps:$4 sm:$0xff]  }
 0x108   :  { %v3202_v32 = vld [vmem:[#allocation4 + $0x10c] ss:$12 sps:$4 sm:$0xff]  }
 0x10a   :  { %2818 = vmatpush3.bf16.msra.mxu0 %v3126_v35  ;;  %2840 = vmatpush3.bf16.msra.mxu1 %v3127_v36  ;;  %v102_v35 = vsub.s32 6, %v3447_v22  ;;  %v3203_v36 = vld [vmem:[#allocation4 + $0x288] ss:$12 sps:$4 sm:$0xff]  }
 0x10b   :  { %1822 = vmatprep.subr.bf16.mxu0 %v3130_v37  ;;  %1863 = vmatprep.subr.bf16.mxu1 %v3133_v38  ;;  %v94_v37 = vsub.s32 4, %v3447_v22  ;;  %v3208_v38 = vld [vmem:[#allocation4 + $0xf4] ss:$12 sps:$4 sm:$0xff]  }
 0x10c   :  { %v103_v40 = vrot.slane %v3455_v24, %v102_v35  ;;  %v3262_v35 = vld [vmem:[%s3705_s8 + $0x60] sm:$0xff]  }
 0x10d   :  { %1112 = vmatmul.mubr.bf16.vlgmr.msra.gmra.mxu0 %v3473_v51  ;;  %1152 = vmatmul.mubr.bf16.vlgmr.msra.gmra.mxu1 %v3471_v47  ;;  %v3143_v51 = vld [vmem:[#allocation4 + $0x1f8] ss:$12 sps:$4 sm:$0xff]  }
 0x10e   :  { %1823 = vmatpush1.bf16.msra.mxu0 %v3128_v41  ;;  %1864 = vmatpush1.bf16.msra.mxu1 %v3131_v42  ;;  %v3151_v47 = vld [vmem:[#allocation4 + $0x1e4] ss:$12 sps:$4 sm:$0xff]   ;;  %v95_v42 = vrot.slane %v3455_v24, %v94_v37  ;;  %v3218_v24 = vld [vmem:[#allocation4 + $0xc0] ss:$12 sps:$4 sm:$0xff]   ;;  %v3264_v37 = vld [vmem:[%s3705_s8 + $0x58] sm:$0xff]  }
 0x10f   :  { %1824 = vmatprep.subr.bf16.mxu0 %v3136_v43  ;;  %1865 = vmatprep.subr.bf16.mxu1 %v3139_v44  ;;  %v3206_v41 = vld [vmem:[#allocation4 + $0xf0] ss:$12 sps:$4 sm:$0xff]  }
 0x110   :  { %1854 = vmatprep.mubr.bf16.mxu0 %v3485_v45  ;;  %1895 = vmatprep.mubr.bf16.mxu1 %v3488_v46  ;;  %v3209_v43 = vld [vmem:[#allocation4 + $0x270] ss:$12 sps:$4 sm:$0xff]   ;;  %v277_v22 = vadd.f32 %v3475_v54, %v95_v42  ;;  %v3269_v42 = vld [vmem:[%s3705_s8 + $0x8] sm:$0xff]  }
 0x111   :  { %v3214_v44 = vld [vmem:[#allocation4 + $0xdc] ss:$12 sps:$4 sm:$0xff]  }
 0x112   :  { %1825 = vmatpush1.bf16.msra.mxu0 %v3134_v48  ;;  %1866 = vmatpush1.bf16.msra.mxu1 %v3137_v49  ;;  %v3217_v48 = vld [vmem:[#allocation4 + $0x25c] ss:$12 sps:$4 sm:$0xff]   ;;  %v318_v49 = vadd.f32 %v3477_v56, %v103_v40  ;;  %v3267_v40 = vld [vmem:[%s3705_s8 + $0x10] sm:$0xff]  }
 0x113   :  { %1826 = vmatprep.subr.bf16.mxu0 %v3142_v50  ;;  %1867 = vmatprep.subr.bf16.mxu1 %v3145_v52  ;;  %v3212_v50 = vld [vmem:[#allocation4 + $0xd8] ss:$12 sps:$4 sm:$0xff]   ;;  %v3225_v56 = vld [vmem:[#allocation4 + $0x2f0] ss:$12 sps:$4 sm:$0xff]  }
 0x114   :  { %v3215_v52 = vld [vmem:[#allocation4 + $0x258] ss:$12 sps:$4 sm:$0xff]   ;;  %v3226_v54 = vld [vmem:[#allocation4 + $0xb0] ss:$12 sps:$4 sm:$0xff]  }
 0x116   :  { %1827 = vmatpush1.bf16.msra.mxu0 %v3140_v53  ;;  %1868 = vmatpush1.bf16.msra.mxu1 %v3143_v51  ;;  %v3220_v53 = vld [vmem:[#allocation4 + $0xc4] ss:$12 sps:$4 sm:$0xff]  }
 0x117   :  { %1828 = vmatprep.subr.bf16.mxu0 %v3148_v55  ;;  %1869 = vmatprep.subr.bf16.mxu1 %v3151_v47  ;;  %v3223_v51 = vld [vmem:[#allocation4 + $0x244] ss:$12 sps:$4 sm:$0xff]   ;;  %v330_v55 = vmax.f32 %v318_v49, 0.0  ;;  %v328_v47 = vmax.f32 %v277_v22, 0.0  ;;  %v3353_v49 = vmov 0.0  }
 0x118   :  { %v3277_v22 = vld [vmem:[%s3705_s8 + $0xb0] sm:$0xff]  }
 0x11a   :  { %1829 = vmatpush1.bf16.msra.mxu0 %v3146_v57  ;;  %1870 = vmatpush1.bf16.msra.mxu1 %v3149_v58  ;;  %v3221_v57 = vld [vmem:[#allocation4 + $0x240] ss:$12 sps:$4 sm:$0xff]   ;;  %v3224_v58 = vld [vmem:[#allocation4 + $0x170] ss:$12 sps:$4 sm:$0xff]  }
 0x11b   :  { %1830 = vmatprep.subr.bf16.mxu0 %v3154_v59  ;;  %1871 = vmatprep.subr.bf16.mxu1 %v3157_v60  ;;  %v3499_v59 = vpack.c.bf16 %v330_v55, %v330_v55  ;;  %v3501_v60 = vpack.c.bf16 %v328_v47, %v328_v47 }
 0x11e   :  { %1831 = vmatpush1.bf16.msra.mxu0 %v3152_v61  ;;  %1872 = vmatpush1.bf16.msra.mxu1 %v3155_v62  ;;  %v3227_v61 = vld [vmem:[#allocation4 + $0x230] ss:$12 sps:$4 sm:$0xff]   ;;  %v3228_v62 = vld [vmem:[#allocation4 + $0x158] ss:$12 sps:$4 sm:$0xff]  }
 0x11f   :  { %1832 = vmatprep.subr.bf16.mxu0 %v3160_v63  ;;  %1873 = vmatprep.subr.bf16.mxu1 %v3163_v0  ;;  %v3229_v63 = vld [vmem:[#allocation4 + $0x2d8] ss:$12 sps:$4 sm:$0xff]  }
 0x120   :  { %v3230_v0 = vld [vmem:[#allocation4 + $0x98] ss:$12 sps:$4 sm:$0xff]  }
 0x122   :  { %1833 = vmatpush1.bf16.msra.mxu0 %v3158_v1  ;;  %1874 = vmatpush1.bf16.msra.mxu1 %v3161_v2  ;;  %v3231_v1 = vld [vmem:[#allocation4 + $0x218] ss:$12 sps:$4 sm:$0xff]   ;;  %v3232_v2 = vld [vmem:[#allocation4 + $0x140] ss:$12 sps:$4 sm:$0xff]  }
 0x123   :  { %1834 = vmatprep.subr.bf16.mxu0 %v3166_v3  ;;  %1875 = vmatprep.subr.bf16.mxu1 %v3169_v4  ;;  %v3233_v3 = vld [vmem:[#allocation4 + $0x2c0] ss:$12 sps:$4 sm:$0xff]  }
 0x124   :  { %v3234_v4 = vld [vmem:[#allocation4 + $0x80] ss:$12 sps:$4 sm:$0xff]  }
 0x126   :  { %1835 = vmatpush1.bf16.msra.mxu0 %v3164_v5  ;;  %1876 = vmatpush1.bf16.msra.mxu1 %v3167_v6  ;;  %v3235_v5 = vld [vmem:[#allocation4 + $0x200] ss:$12 sps:$4 sm:$0xff]   ;;  %v3236_v6 = vld [vmem:[#allocation4 + $0x128] ss:$12 sps:$4 sm:$0xff]  }
 0x127   :  { %1836 = vmatprep.subr.bf16.mxu0 %v3172_v7  ;;  %1877 = vmatprep.subr.bf16.mxu1 %v3175_v8  ;;  %v3237_v7 = vld [vmem:[#allocation4 + $0x2a8] ss:$12 sps:$4 sm:$0xff]  }
 0x128   :  { %v3238_v8 = vld [vmem:[#allocation4 + $0x68] ss:$12 sps:$4 sm:$0xff]  }
 0x12a   :  { %1837 = vmatpush1.bf16.msra.mxu0 %v3170_v9  ;;  %1878 = vmatpush1.bf16.msra.mxu1 %v3173_v10  ;;  %v3240_v9 = vld [vmem:[#allocation4 + $0x110] ss:$12 sps:$4 sm:$0xff]  }
 0x12b   :  { %1838 = vmatprep.subr.bf16.mxu0 %v3178_v11  ;;  %1879 = vmatprep.subr.bf16.mxu1 %v3181_v12  ;;  %v3241_v10 = vld [vmem:[#allocation4 + $0x290] ss:$12 sps:$4 sm:$0xff]   ;;  %v3244_v12 = vld [vmem:[#allocation4 + $0xf8] ss:$12 sps:$4 sm:$0xff]  }
 0x12c   :  { %v3243_v11 = vld [vmem:[#allocation4 + $0x1d0] ss:$12 sps:$4 sm:$0xff]  }
 0x12e   :  { %1839 = vmatpush2.bf16.msra.mxu0 %v3176_v13  ;;  %1880 = vmatpush2.bf16.msra.mxu1 %v3179_v14  ;;  %v3245_v13 = vld [vmem:[#allocation4 + $0x278] ss:$12 sps:$4 sm:$0xff]  }
 0x12f   :  { %1840 = vmatprep.subr.bf16.mxu0 %v3184_v15  ;;  %1881 = vmatprep.subr.bf16.mxu1 %v3187_v16  ;;  %v3246_v14 = vld [vmem:[#allocation4 + $0x38] ss:$12 sps:$4 sm:$0xff]   ;;  %v3248_v16 = vld [vmem:[#allocation4 + $0xe0] ss:$12 sps:$4 sm:$0xff]  }
 0x130   :  { %v3247_v15 = vld [vmem:[#allocation4 + $0x1b8] ss:$12 sps:$4 sm:$0xff]  }
 0x132   :  { %1841 = vmatpush2.bf16.msra.mxu0 %v3182_v17  ;;  %1882 = vmatpush2.bf16.msra.mxu1 %v3185_v18  ;;  %v3249_v17 = vld [vmem:[#allocation4 + $0x260] ss:$12 sps:$4 sm:$0xff]  }
 0x133   :  { %1842 = vmatprep.subr.bf16.mxu0 %v3190_v19  ;;  %1883 = vmatprep.subr.bf16.mxu1 %v3193_v20  ;;  %v3250_v18 = vld [vmem:[#allocation4 + $0x20] ss:$12 sps:$4 sm:$0xff]   ;;  %v3252_v20 = vld [vmem:[#allocation4 + $0xc8] ss:$12 sps:$4 sm:$0xff]  }
 0x134   :  { %v3251_v19 = vld [vmem:[#allocation4 + $0x1a0] ss:$12 sps:$4 sm:$0xff]  }
 0x136   :  { %1843 = vmatpush2.bf16.msra.mxu0 %v3188_v21  ;;  %1884 = vmatpush2.bf16.msra.mxu1 %v3191_v27  ;;  %v3253_v21 = vld [vmem:[#allocation4 + $0x248] ss:$12 sps:$4 sm:$0xff]  }
 0x137   :  { %1844 = vmatprep.subr.bf16.mxu0 %v3196_v28  ;;  %1885 = vmatprep.subr.bf16.mxu1 %v3199_v29  ;;  %v3254_v27 = vld [vmem:[#allocation4 + $0x8] ss:$12 sps:$4 sm:$0xff]   ;;  %v3256_v29 = vld [vmem:[%s3705_s8 + $0x78] sm:$0xff]  }
 0x138   :  { %v3255_v28 = vld [vmem:[#allocation4 + $0x188] ss:$12 sps:$4 sm:$0xff]  }
 0x13a   :  { %1845 = vmatpush2.bf16.msra.mxu0 %v3194_v30  ;;  %1886 = vmatpush2.bf16.msra.mxu1 %v3197_v31  ;;  %v3257_v30 = vld [vmem:[%s3705_s8 + $0x38] sm:$0xff]   ;;  %v3258_v31 = vld [vmem:[%s3705_s8 + $0x70] sm:$0xff]  }
 0x13b   :  { %1846 = vmatprep.subr.bf16.mxu0 %v3202_v32  ;;  %1887 = vmatprep.subr.bf16.mxu1 %v3205_v33  ;;  %v3259_v32 = vld [vmem:[%s3705_s8 + $0x30] sm:$0xff]   ;;  %v3260_v33 = vld [vmem:[%s3705_s8 + $0x68] sm:$0xff]  }
 0x13e   :  { %1847 = vmatpush2.bf16.msra.mxu0 %v3200_v34  ;;  %1888 = vmatpush2.bf16.msra.mxu1 %v3203_v36  ;;  %v3261_v34 = vld [vmem:[%s3705_s8 + $0x28] sm:$0xff]   ;;  %v3263_v36 = vld [vmem:[%s3705_s8 + $0x20] sm:$0xff]  }
 0x13f   :  { %1848 = vmatprep.subr.bf16.mxu0 %v3208_v38  ;;  %1889 = vmatprep.subr.bf16.mxu1 %v3211_v39  ;;  %v3265_v38 = vld [vmem:[%s3705_s8 + $0x18] sm:$0xff]   ;;  %v3266_v39 = vld [vmem:[%s3705_s8 + $0x50] sm:$0xff]  }
 0x142   :  { %1849 = vmatpush2.bf16.msra.mxu0 %v3206_v41  ;;  %1890 = vmatpush2.bf16.msra.mxu1 %v3209_v43  ;;  %v3268_v41 = vld [vmem:[%s3705_s8 + $0x48] sm:$0xff]   ;;  %v3270_v43 = vld [vmem:[%s3705_s8 + $0x40] sm:$0xff]  }
 0x143   :  { %1850 = vmatprep.subr.bf16.mxu0 %v3214_v44  ;;  %1891 = vmatprep.subr.bf16.mxu1 %v3217_v48  ;;  %v3271_v44 = vld [vmem:[%s3705_s8] sm:$0xff]   ;;  %v3272_v48 = vld [vmem:[%s3704_s7 + $0x78] sm:$0xff]  }
 0x146   :  { %1851 = vmatpush2.bf16.msra.mxu0 %v3212_v50  ;;  %1892 = vmatpush2.bf16.msra.mxu1 %v3215_v52  ;;  %v3274_v50 = vld [vmem:[%s3705_s8 + $0xb8] sm:$0xff]   ;;  %v3280_v52 = vld [vmem:[%s3705_s8 + $0xa8] sm:$0xff]  }
 0x147   :  { %1852 = vmatprep.subr.bf16.mxu0 %v3220_v53  ;;  %1893 = vmatprep.subr.bf16.mxu1 %v3223_v51  ;;  %v3283_v53 = vld [vmem:[%s3705_s8 + $0xa0] sm:$0xff]  }
 0x148   :  { %v468_v51 = vld [vmem:[%s3701_s4] sm:$0x7] }
 0x149   :  { %v473_v55 = vrot.slane %v468_v51, %v3450_v23  ;;  %v477_v47 = vrot.slane %v468_v51, %v3461_v26 }
 0x14a   :  { %1853 = vmatpush2.bf16.msra.mxu0 %v3218_v24  ;;  %1894 = vmatpush2.bf16.msra.mxu1 %v3221_v57  ;;  %v3286_v24 = vld [vmem:[%s3705_s8 + $0x98] sm:$0xff]  }
 0x14b   :  { %2847 = vmatprep.subr.bf16.mxu0 %v3224_v58  ;;  %2869 = vmatprep.subr.bf16.mxu1 %v3225_v56 }
 0x14d   :  { %1855 = vmatmul.mubr.bf16.vlgmr.msra.gmra.mxu0 %v3501_v60  ;;  %1896 = vmatmul.mubr.bf16.vlgmr.msra.gmra.mxu1 %v3499_v59 }
 0x14e   :  { %2848 = vmatpush3.bf16.msra.mxu0 %v3226_v54  ;;  %1936 = vmatprep.mubr.bf16.mxu0 %v3485_v45  ;;  %v3239_v45 = vld [vmem:[#allocation4 + $0x1e8] ss:$12 sps:$4 sm:$0xff]  }
 0x14f   :  { %2870 = vmatpush3.bf16.msra.mxu1 %v3227_v61  ;;  %1976 = vmatprep.mubr.bf16.mxu1 %v3488_v46  ;;  %v3242_v46 = vld [vmem:[#allocation4 + $0x50] ss:$12 sps:$4 sm:$0xff]  }
 0x150   :  { %2849 = vmatprep.subr.bf16.mxu0 %v3228_v62  ;;  %2871 = vmatprep.subr.bf16.mxu1 %v3229_v63 }
 0x152   :  { %2850 = vmatpush3.bf16.msra.mxu0 %v3230_v0 }
 0x153   :  { %2872 = vmatpush3.bf16.msra.mxu1 %v3231_v1  ;;  %2851 = vmatprep.subr.bf16.mxu0 %v3232_v2  ;;  %v3292_v2 = vld [vmem:[%s3705_s8 + $0x88] sm:$0xff]  }
 0x154   :  { %2873 = vmatprep.subr.bf16.mxu1 %v3233_v3 }
 0x156   :  { %2852 = vmatpush3.bf16.msra.mxu0 %v3234_v4 }
 0x157   :  { %2874 = vmatpush3.bf16.msra.mxu1 %v3235_v5  ;;  %2853 = vmatprep.subr.bf16.mxu0 %v3236_v6  ;;  %v3295_v5 = vld [vmem:[%s3705_s8 + $0x80] sm:$0xff]  }
 0x158   :  { %2875 = vmatprep.subr.bf16.mxu1 %v3237_v7 }
 0x15a   :  { %2854 = vmatpush3.bf16.msra.mxu0 %v3238_v8  ;;  %v481_v8 = vrot.slane %v468_v51, %v3458_v25  ;;  %v3287_v51 = vld [vmem:[%s3704_s7 + $0x50] sm:$0xff]  }
 0x15b   :  { %2876 = vmatpush3.bf16.msra.mxu1 %v3239_v45  ;;  %2855 = vmatprep.subr.bf16.mxu0 %v3240_v9 }
 0x15c   :  { %2877 = vmatprep.subr.bf16.mxu1 %v3241_v10 }
 0x15e   :  { %2856 = vmatpush3.bf16.msra.mxu0 %v3242_v46 }
 0x15f   :  { %2878 = vmatpush3.bf16.msra.mxu1 %v3243_v11  ;;  %2857 = vmatprep.subr.bf16.mxu0 %v3244_v12 }
 0x160   :  { %2879 = vmatprep.subr.bf16.mxu1 %v3245_v13 }
 0x162   :  { %2858 = vmatpush3.bf16.msra.mxu0 %v3246_v14 }
 0x163   :  { %2880 = vmatpush3.bf16.msra.mxu1 %v3247_v15  ;;  %2859 = vmatprep.subr.bf16.mxu0 %v3248_v16 }
 0x164   :  { %2881 = vmatprep.subr.bf16.mxu1 %v3249_v17  ;;  %v1293_v17 = vld [vmem:[%s3703_s6] sm:$0x7] }
 0x166   :  { %2860 = vmatpush3.bf16.msra.mxu0 %v3250_v18  ;;  %v1298_v18 = vrot.slane %v1293_v17, %v3450_v23  ;;  %v3273_v23 = vld [vmem:[%s3704_s7 + $0x38] sm:$0xff]  }
 0x167   :  { %2882 = vmatpush3.bf16.msra.mxu1 %v3251_v19  ;;  %2861 = vmatprep.subr.bf16.mxu0 %v3252_v20  ;;  %v1302_v19 = vrot.slane %v1293_v17, %v3461_v26 }
 0x168   :  { %2883 = vmatprep.subr.bf16.mxu1 %v3253_v21 }
 0x16a   :  { %2862 = vmatpush3.bf16.msra.mxu0 %v3254_v27 }
 0x16b   :  { %2884 = vmatpush3.bf16.msra.mxu1 %v3255_v28  ;;  %2891 = vmatprep.subr.bf16.mxu0 %v3256_v29 }
 0x16c   :  { %2953 = vmatprep.subr.bf16.mxu1 %v3353_v49 }
 0x16d   :  { %1937 = vmatmul.mubr.bf16.vlgmr.msra.gmra.mxu0 %v3501_v60 }
 0x16e   :  { %1977 = vmatmul.mubr.bf16.vlgmr.msra.gmra.mxu1 %v3499_v59  ;;  %2892 = vmatpush3.bf16.msra.mxu0 %v3257_v30  ;;  %v3289_v59 = vld [vmem:[%s3705_s8 + $0x90] sm:$0xff]  }
 0x16f   :  { %2893 = vmatprep.subr.bf16.mxu0 %v3258_v31  ;;  %2954 = vmatpush3.bf16.msra.mxu1 %v3274_v50  ;;  %v3281_v50 = vld [vmem:[%s3704_s7 + $0x60] sm:$0xff]  }
 0x170   :  { %2955 = vmatprep.subr.bf16.mxu1 %v3353_v49  ;;  %2969 = vmatprep.mubr.msk.bf16.mxu1 %vm3354_vm1, %v3353_v49 }
 0x172   :  { %2894 = vmatpush3.bf16.msra.mxu0 %v3259_v32 }
 0x173   :  { %2895 = vmatprep.subr.bf16.mxu0 %v3260_v33  ;;  %2956 = vmatpush3.bf16.msra.mxu1 %v3277_v22  ;;  %v3282_v22 = vld [vmem:[%s3704_s7 + $0x20] sm:$0xff]  }
 0x174   :  { %2957 = vmatprep.subr.bf16.mxu1 %v3353_v49 }
 0x176   :  { %2896 = vmatpush3.bf16.msra.mxu0 %v3261_v34 }
 0x177   :  { %2897 = vmatprep.subr.bf16.mxu0 %v3262_v35  ;;  %2958 = vmatpush3.bf16.msra.mxu1 %v3280_v52  ;;  %v3284_v52 = vld [vmem:[%s3704_s7 + $0x58] sm:$0xff]  }
 0x178   :  { %2959 = vmatprep.subr.bf16.mxu1 %v3353_v49 }
 0x17a   :  { %2898 = vmatpush3.bf16.msra.mxu0 %v3263_v36 }
 0x17b   :  { %2899 = vmatprep.subr.bf16.mxu0 %v3264_v37  ;;  %2960 = vmatpush3.bf16.msra.mxu1 %v3283_v53  ;;  %v3285_v53 = vld [vmem:[%s3704_s7 + $0x18] sm:$0xff]  }
 0x17c   :  { %2961 = vmatprep.subr.bf16.mxu1 %v3353_v49 }
 0x17e   :  { %2900 = vmatpush3.bf16.msra.mxu0 %v3265_v38 }
 0x17f   :  { %2901 = vmatprep.subr.bf16.mxu0 %v3266_v39  ;;  %2962 = vmatpush3.bf16.msra.mxu1 %v3286_v24  ;;  %v3290_v24 = vld [vmem:[%s3704_s7 + $0x48] sm:$0xff]  }
 0x180   :  { %2963 = vmatprep.subr.bf16.mxu1 %v3353_v49 }
 0x182   :  { %2902 = vmatpush3.bf16.msra.mxu0 %v3267_v40 }
 0x183   :  { %2903 = vmatprep.subr.bf16.mxu0 %v3268_v41  ;;  %2964 = vmatpush3.bf16.msra.mxu1 %v3289_v59  ;;  %v3275_v41 = vld [vmem:[%s3704_s7 + $0x70] sm:$0xff]  }
 0x184   :  { %2965 = vmatprep.subr.bf16.mxu1 %v3353_v49 }
 0x186   :  { %2904 = vmatpush3.bf16.msra.mxu0 %v3269_v42 }
 0x187   :  { %2905 = vmatprep.subr.bf16.mxu0 %v3270_v43  ;;  %2966 = vmatpush3.bf16.msra.mxu1 %v3292_v2  ;;  %v3276_v43 = vld [vmem:[%s3704_s7 + $0x30] sm:$0xff]  }
 0x188   :  { %2967 = vmatprep.subr.bf16.mxu1 %v3353_v49 }
 0x18a   :  { %2906 = vmatpush3.bf16.msra.mxu0 %v3271_v44  ;;  %v3278_v44 = vld [vmem:[%s3704_s7 + $0x68] sm:$0xff]  }
 0x18b   :  { %2922 = vmatprep.subr.bf16.mxu0 %v3272_v48  ;;  %2968 = vmatpush3.bf16.msra.mxu1 %v3295_v5  ;;  %v3279_v48 = vld [vmem:[%s3704_s7 + $0x28] sm:$0xff]  }
 0x18c   :  { %2973 = vmatprep.subr.bf16.mxu1 %v3353_v49 }
 0x1ad   :  { %v1031_v57 = vpop.f32.mrf.mxu0  ;;  %v1072_v56 = vpop.f32.mrf.mxu1 }
 0x1ae   :  { %v1032_v58 = vadd.f32 %v1031_v57, %v473_v55  ;;  %v3288_v55 = vld [vmem:[%s3704_s7 + $0x10] sm:$0xff]  }
 0x1af   :  { %v1033_v54 = vpop.f32.mrf.mxu0  ;;  %v1074_v62 = vpop.f32.mrf.mxu1 }
 0x1b0   :  { %v3589_v60 = vadd.f32 %v1072_v56, %v1032_v58  ;;  %v1034_v61 = vadd.f32 %v1033_v54, %v477_v47  ;;  %v1306_v58 = vrot.slane %v1293_v17, %v3458_v25  ;;  %v3291_v56 = vld [vmem:[%s3704_s7 + $0x8] sm:$0xff]   ;;  %v3293_v54 = vld [vmem:[%s3704_s7 + $0x40] sm:$0xff]  }
 0x1b1   :  { %v1035_v63 = vpop.f32.mrf.mxu0  ;;  %v1076_v1 = vpop.f32.mrf.mxu1  ;;  %v3294_v25 = vld [vmem:[%s3704_s7] sm:$0xff]  }
 0x1b2   :  { %v1075_v0 = vadd.f32 %v1074_v62, %v1034_v61 }
 0x1b3   :  { %v1036_v3 = vpop.f32.mrf.mxu0  ;;  %v1077_v4 = vpop.f32.mrf.mxu1 }
 0x1b4   :  { %v1160_v37 = vmax.f32 %v1075_v0, 0.0  ;;  %v1159_v3 = vmax.f32 %v3589_v60, 0.0  ;;  %v3298_v60 = vld [vmem:[%s3704_s7 + $0xa8] sm:$0xff]  }
 0x1b6   :  { %v1163_v42 = vpack.c.bf16 %v1160_v37, %v1160_v37 }
 0x1cd   :  { %v2819_v6 = vpop.f32.mrf.mxu0  ;;  %v2841_v7 = vpop.f32.mrf.mxu1 }
 0x1cf   :  { %v2820_v45 = vpop.f32.mrf.mxu0  ;;  %v2842_v10 = vpop.f32.mrf.mxu1 }
 0x1d0   :  { %v2821_v9 = vadd.f32 %v2820_v45, %v2819_v6  ;;  %v2843_v46 = vadd.f32 %v2842_v10, %v2841_v7  ;;  %v3296_v45 = vld [vmem:[%s3704_s7 + $0xb8] sm:$0xff]   ;;  %v3297_v10 = vld [vmem:[%s3704_s7 + $0xb0] sm:$0xff]  }
 0x1d1   :  { %v2822_v11 = vpop.f32.mrf.mxu0  ;;  %v2844_v13 = vpop.f32.mrf.mxu1 }
 0x1d2   :  { %v1114_v12 = vadd.f32 %v2821_v9, %v481_v8  ;;  %v1162_v8 = vpack.c.bf16 %v1159_v3, %v1159_v3  ;;  %v3300_v11 = vld [vmem:[%s3704_s7 + $0x98] sm:$0xff]   ;;  %v3302_v13 = vld [vmem:[%s3704_s7 + $0x88] sm:$0xff]  }
 0x1d3   :  { %v2823_v14 = vpop.f32.mrf.mxu0  ;;  %v2845_v16 = vpop.f32.mrf.mxu1 }
 0x1d4   :  { %v3603_v15 = vadd.f32 %v2843_v46, %v1114_v12  ;;  %v3299_v46 = vld [vmem:[%s3704_s7 + $0xa0] sm:$0xff]   ;;  %v3301_v12 = vld [vmem:[%s3704_s7 + $0x90] sm:$0xff]  }
 0x1d5   :  { %v3303_v14 = vld [vmem:[%s3704_s7 + $0x80] sm:$0xff]  }
 0x1d6   :  { %v1161_v16 = vmax.f32 %v3603_v15, 0.0 }
 0x1d8   :  { %v1164_v17 = vpack.c.bf16 %v1161_v16, %v1161_v16 }
 0x20d   :  { %v1856_v20 = vpop.f32.mrf.mxu0  ;;  %v1897_v27 = vpop.f32.mrf.mxu1 }
 0x20e   :  { %v1857_v21 = vadd.f32 %v1856_v20, %v1298_v18 }
 0x20f   :  { %v1858_v28 = vpop.f32.mrf.mxu0  ;;  %v1899_v31 = vpop.f32.mrf.mxu1 }
 0x210   :  { %v1898_v29 = vadd.f32 %v1897_v27, %v1857_v21  ;;  %v1859_v30 = vadd.f32 %v1858_v28, %v1302_v19 }
 0x211   :  { %v1860_v32 = vpop.f32.mrf.mxu0  ;;  %v1901_v34 = vpop.f32.mrf.mxu1 }
 0x212   :  { %v1900_v33 = vadd.f32 %v1899_v31, %v1859_v30  ;;  %v1984_v35 = vmax.f32 %v1898_v29, 0.0 }
 0x213   :  { %v1861_v36 = vpop.f32.mrf.mxu0  ;;  %v1902_v39 = vpop.f32.mrf.mxu1 }
 0x214   :  { %v1985_v38 = vmax.f32 %v1900_v33, 0.0  ;;  %v1987_v26 = vpack.c.bf16 %v1984_v35, %v1984_v35 }
 0x216   :  { %v1988_v40 = vpack.c.bf16 %v1985_v38, %v1985_v38  ;;  %v2802_v38 = vld [vmem:[%s3706_s9] ss:$0 sm:$0xff] }
 0x218   :  { %2262 = vmatprep.mubr.bf16.mxu0 %v1988_v40 }
 0x219   :  { %2263 = vmatmul.mubr.bf16.vlgmr.msra.gmra.mxu0 %v1987_v26 }
 0x21a   :  { %2923 = vmatpush3.bf16.msra.mxu0 %v3273_v23  ;;  %2486 = vmatprep.mubr.bf16.mxu0 %v1163_v42 }
 0x21b   :  { %2924 = vmatprep.subr.bf16.mxu0 %v3275_v41 }
 0x21e   :  { %2925 = vmatpush3.bf16.msra.mxu0 %v3276_v43 }
 0x21f   :  { %2926 = vmatprep.subr.bf16.mxu0 %v3278_v44 }
 0x222   :  { %2927 = vmatpush3.bf16.msra.mxu0 %v3279_v48 }
 0x223   :  { %2928 = vmatprep.subr.bf16.mxu0 %v3281_v50 }
 0x226   :  { %2929 = vmatpush3.bf16.msra.mxu0 %v3282_v22 }
 0x227   :  { %2930 = vmatprep.subr.bf16.mxu0 %v3284_v52 }
 0x22a   :  { %2931 = vmatpush3.bf16.msra.mxu0 %v3285_v53 }
 0x22b   :  { %2932 = vmatprep.subr.bf16.mxu0 %v3287_v51 }
 0x22d   :  { %v2863_v47 = vpop.f32.mrf.mxu0 }
 0x22e   :  { %v2885_v57 = vpop.f32.mrf.mxu1  ;;  %2933 = vmatpush3.bf16.msra.mxu0 %v3288_v55 }
 0x22f   :  { %v2864_v59 = vpop.f32.mrf.mxu0  ;;  %2934 = vmatprep.subr.bf16.mxu0 %v3290_v24 }
 0x230   :  { %v2865_v61 = vadd.f32 %v2864_v59, %v2863_v47  ;;  %v2886_v62 = vpop.f32.mrf.mxu1 }
 0x231   :  { %v2866_v63 = vpop.f32.mrf.mxu0  ;;  %v2887_v1 = vadd.f32 %v2886_v62, %v2885_v57 }
 0x232   :  { %v1939_v0 = vadd.f32 %v2865_v61, %v1306_v58  ;;  %v2888_v2 = vpop.f32.mrf.mxu1  ;;  %2935 = vmatpush3.bf16.msra.mxu0 %v3291_v56 }
 0x233   :  { %v2867_v4 = vpop.f32.mrf.mxu0  ;;  %2936 = vmatprep.subr.bf16.mxu0 %v3293_v54 }
 0x234   :  { %v1979_v5 = vadd.f32 %v2887_v1, %v1939_v0  ;;  %v2889_v6 = vpop.f32.mrf.mxu1 }
 0x236   :  { %v1986_v7 = vmax.f32 %v1979_v5, 0.0  ;;  %2937 = vmatpush3.bf16.msra.mxu0 %v3294_v25 }
 0x238   :  { %v1989_v9 = vpack.c.bf16 %v1986_v7, %v1986_v7 }
 0x239   :  { %2487 = vmatmul.mubr.bf16.vlgmr.msra.gmra.mxu0 %v1162_v8 }
 0x23a   :  { %2970 = vmatmul.mubr.bf16.vlgmr.msra.gmra.mxu1 %v1989_v9 }
 0x23b   :  { %2974 = vmatpush3.bf16.msra.mxu1 %v3296_v45  ;;  %2989 = vmatprep.mubr.msk.bf16.mxu1 %vm3354_vm1, %v3353_v49 }
 0x23c   :  { %2975 = vmatprep.subr.bf16.mxu1 %v3353_v49 }
 0x23f   :  { %2976 = vmatpush3.bf16.msra.mxu1 %v3297_v10 }
 0x240   :  { %2977 = vmatprep.subr.bf16.mxu1 %v3353_v49 }
 0x243   :  { %2978 = vmatpush3.bf16.msra.mxu1 %v3298_v60 }
 0x244   :  { %2979 = vmatprep.subr.bf16.mxu1 %v3353_v49 }
 0x247   :  { %2980 = vmatpush3.bf16.msra.mxu1 %v3299_v46 }
 0x248   :  { %2981 = vmatprep.subr.bf16.mxu1 %v3353_v49 }
 0x24b   :  { %2982 = vmatpush3.bf16.msra.mxu1 %v3300_v11 }
 0x24c   :  { %2983 = vmatprep.subr.bf16.mxu1 %v3353_v49 }
 0x24f   :  { %2984 = vmatpush3.bf16.msra.mxu1 %v3301_v12 }
 0x250   :  { %2985 = vmatprep.subr.bf16.mxu1 %v3353_v49 }
 0x253   :  { %2986 = vmatpush3.bf16.msra.mxu1 %v3302_v13 }
 0x254   :  { %2987 = vmatprep.subr.bf16.mxu1 %v3353_v49 }
 0x257   :  { %2988 = vmatpush3.bf16.msra.mxu1 %v3303_v14 }
 0x25a   :  { %2990 = vmatmul.mubr.bf16.vlgmr.msra.gmra.mxu1 %v1164_v17 }
 0x2d9   :  { %v2907_v18 = vpop.f32.mrf.mxu0 }
 0x2db   :  { %v2908_v19 = vpop.f32.mrf.mxu0 }
 0x2dc   :  { %v2909_v35 = vadd.f32 %v2908_v19, %v2907_v18 }
 0x2dd   :  { %v2910_v20 = vpop.f32.mrf.mxu0 }
 0x2df   :  { %v2911_v21 = vpop.f32.mrf.mxu0 }
 0x2f9   :  { %v2938_v27 = vpop.f32.mrf.mxu0 }
 0x2fa   :  { %v2304_v28 = vpop.f32.mrf.mxu1 }
 0x2fb   :  { %v2939_v29 = vpop.f32.mrf.mxu0  ;;  %v2305_v36 = vadd.f32 %v2909_v35, %v2304_v28 }
 0x2fc   :  { %v2971_v30 = vpop.f32.mrf.mxu1  ;;  %v2940_v15 = vadd.f32 %v2939_v29, %v2938_v27 }
 0x2fd   :  { %v2941_v31 = vpop.f32.mrf.mxu0 }
 0x2fe   :  { %v2307_v32 = vpop.f32.mrf.mxu1  ;;  %v2489_v37 = vadd.f32 %v2940_v15, %v2305_v36 }
 0x2ff   :  { %v2942_v33 = vpop.f32.mrf.mxu0 }
 0x300   :  { %v2972_v34 = vpop.f32.mrf.mxu1 }
 0x31a   :  { %v2528_v49 = vpop.f32.mrf.mxu1 }
 0x31b   :  { %v2529_v39 = vadd.f32 %v2528_v49, %v2489_v37 }
 0x31c   :  { %v2991_v40 = vpop.f32.mrf.mxu1 }
 0x31d   :  { %v2541_v23 = vadd.f32 %v2802_v38, %v2529_v39 }
 0x31e   :  { %v2531_v26 = vpop.f32.mrf.mxu1 }
 0x31f   :  { %2543 = vst.msk [vmem:[%s3707_s10] sm:$0xff] %vm2542_vm2, %v2541_v23 }
 0x320   :  { %v2992_v41 = vpop.f32.mrf.mxu1 }
 0x321   :  { %2548 = vsyncpa [#allocation3], 1 }
 0x322   :  { %2549 = vsyncpa [#allocation5], 1 }

</bundles_post_ra>
